<compile_context>
chip_gen: v7x
topology: tpu7x:2x2x1
jax: 0.10.0
libtpu: 0.0.40
codegen_flags: <defaults>
</compile_context>

<pallas_src>
import jax
import jax.numpy as jnp
from jax.experimental import pallas as pl
from jax.experimental.pallas import tpu as pltpu

# (1.2545 - 0.3933) is evaluated in Python double precision first, exactly
# like PyTorch's scalar handling, then cast to the tensor dtype.
_C = 1.2545 - 0.3933

# Below this many bytes the fixed pallas_call launch + pipeline prologue
# dominates; XLA's fused elementwise op is faster.
_BYPASS_BYTES = 256 * 1024


def _tp2_kernel(p_ref, o_ref):
    p = p_ref[...]
    c = jnp.asarray(_C, dtype=p.dtype)
    # Same association / rounding as the PyTorch expression: (c * p) * p.
    o_ref[...] = (c * p) * p


def _compiler_params(vmem_limit_bytes):
    return pltpu.CompilerParams(
        dimension_semantics=("parallel",),
        vmem_limit_bytes=vmem_limit_bytes,
    )


def _vmem_budget():
    """(target_block_bytes, vmem_limit_bytes) tuned per TPU generation."""
    # Safe defaults for every generation (v7x: 64 MiB VMEM/TC, 32 MiB scoped).
    target, limit = 4 * 1024 * 1024, 32 * 1024 * 1024
    try:
        vmem = getattr(pltpu.get_tpu_info(), "vmem_capacity_bytes", 0)
        if vmem and vmem >= 100 * 1024 * 1024:
            # v5e / v6e (128 MiB VMEM): fewer, larger grid steps.
            target, limit = 8 * 1024 * 1024, 48 * 1024 * 1024
    except Exception:
        pass
    return target, limit


def _pick_block_rows(rows, lane, itemsize, target_block_bytes):
    """Row-block size: dtype-aware sublane rounding + >=2 balanced blocks."""
    # Sub-32-bit dtypes pack 2/4 rows per sublane: 8 (f32) / 16 (bf16) / 32 (i8).
    sub = 8 * max(1, 4 // itemsize)
    block_rows = max(sub, (target_block_bytes // (lane * itemsize)) // sub * sub)
    if block_rows >= rows:
        # Small/medium input: prefer two balanced, sublane-aligned blocks so
        # both v7x TensorCores can run (grid axis is "parallel").
        half = pl.cdiv(pl.cdiv(rows, 2), sub) * sub
        block_rows = half if half < rows else rows  # full-extent block is always legal
    return block_rows


def _pick_block_elems(n, itemsize, target_block_bytes):
    """1-D (ragged) block size: lane-multiple blocks, >=2 where possible."""
    max_blk = max(1024, (target_block_bytes // itemsize) // 1024 * 1024)
    if n <= 2 * 1024:
        return n                      # single full-extent block (always legal)
    half = pl.cdiv(pl.cdiv(n, 2), 1024) * 1024
    return min(max_blk, half) if half < n else n


def _run_slab(slab, block_rows, vmem_limit_bytes):
    rows, lane = slab.shape
    n = rows * lane
    itemsize = jnp.dtype(slab.dtype).itemsize
    return pl.pallas_call(
        _tp2_kernel,
        out_shape=jax.ShapeDtypeStruct((rows, lane), slab.dtype),
        grid_spec=pltpu.PrefetchScalarGridSpec(
            num_scalar_prefetch=0,
            grid=(pl.cdiv(rows, block_rows),),
            in_specs=[pl.BlockSpec((block_rows, lane), lambda i: (i, 0))],
            out_specs=pl.BlockSpec((block_rows, lane), lambda i: (i, 0)),
        ),
        compiler_params=_compiler_params(vmem_limit_bytes),
        cost_estimate=pl.CostEstimate(
            flops=2 * n, transcendentals=0, bytes_accessed=2 * n * itemsize),
    )(slab)


def _run_flat(flat, block_elems, vmem_limit_bytes):
    """Ragged element count: 1-D blocks; Pallas masks the partial last block."""
    n = flat.shape[0]
    itemsize = jnp.dtype(flat.dtype).itemsize
    return pl.pallas_call(
        _tp2_kernel,
        out_shape=jax.ShapeDtypeStruct((n,), flat.dtype),
        grid_spec=pltpu.PrefetchScalarGridSpec(
            num_scalar_prefetch=0,
            grid=(pl.cdiv(n, block_elems),),
            in_specs=[pl.BlockSpec((block_elems,), lambda i: (i,))],
            out_specs=pl.BlockSpec((block_elems,), lambda i: (i,)),
        ),
        compiler_params=_compiler_params(vmem_limit_bytes),
        cost_estimate=pl.CostEstimate(
            flops=2 * n, transcendentals=0, bytes_accessed=2 * n * itemsize),
    )(flat)


def tp2_forward(p, *, force_pallas=False):
    """Elementwise (1.2545 - 0.3933) * p * p via a Pallas TPU kernel."""
    # PyTorch promotes float-scalar * int-tensor to float32; mirror that so
    # the constant is never truncated for non-float inputs.
    if not jnp.issubdtype(p.dtype, jnp.floating):
        p = p.astype(jnp.float32)

    orig_shape = p.shape
    itemsize = jnp.dtype(p.dtype).itemsize
    n = p.size
    if n == 0:
        return p

    # Tiny-tensor bypass: let XLA's fused elementwise op handle it.
    if not force_pallas and n * itemsize < _BYPASS_BYTES:
        c = jnp.asarray(_C, dtype=p.dtype)
        return (c * p) * p

    target_block_bytes, vmem_limit_bytes = _vmem_budget()

    # Prefer a lane-dense 2-D slab.  For an already-2-D, lane-aligned input we
    # tile the native shape (no reshape at all); otherwise the flatten is a
    # metadata-only reshape for contiguous buffers.
    # TODO(synk): tile general N-D shapes (ndim > 2) directly so non-contiguous
    # inputs inside a larger jit never materialize the reshape.
    if (p.ndim == 2 and p.shape[1] % 128 == 0
            and p.shape[1] * itemsize * 32 <= target_block_bytes):
        slab = p
        lane = p.shape[1]
    else:
        flat = p.reshape(-1)
        lane = next((w for w in (1024, 512, 256, 128) if n % w == 0), None)
        if lane is None:
            # Ragged element count: single-pass 1-D kernel with masked tail
            # (no jnp.pad / slice-back).
            block_elems = _pick_block_elems(n, itemsize, target_block_bytes)
            out = _run_flat(flat, block_elems, vmem_limit_bytes)
            return out.reshape(orig_shape)
        slab = flat.reshape(n // lane, lane)

    rows = slab.shape[0]
    block_rows = _pick_block_rows(rows, lane, itemsize, target_block_bytes)
    out = _run_slab(slab, block_rows, vmem_limit_bytes)
    return out.reshape(orig_shape)


if __name__ == "__main__":
    key = jax.random.PRNGKey(0)
    # Tp_2(m, l) ignores its constructor args; forward is elementwise on p.
    x = jax.random.normal(key, (2, 4, 16, 16), dtype=jnp.float32)

    # Exercise the lane-dense 2-D slab Pallas path at the test shape.
    y = tp2_forward(x, force_pallas=True)
    jax.block_until_ready(y)
    y_ref = (1.2545 - 0.3933) * x * x
    assert y.shape == x.shape and y.dtype == x.dtype
    assert jnp.allclose(y, y_ref, atol=1e-6, rtol=1e-6)

    # Ragged element count (105, not a multiple of 128) -> 1-D masked path.
    x2 = jax.random.normal(jax.random.PRNGKey(0), (3, 5, 7), dtype=jnp.float32)
    y2 = tp2_forward(x2, force_pallas=True)
    jax.block_until_ready(y2)
    assert jnp.allclose(y2, (1.2545 - 0.3933) * x2 * x2, atol=1e-6, rtol=1e-6)

    # Default dispatch: tiny tensors take the fused-XLA bypass.
    y3 = tp2_forward(x)
    jax.block_until_ready(y3)
    assert jnp.allclose(y3, y_ref, atol=1e-6, rtol=1e-6)

    print("KERNEL_OK")
</pallas_src>

<mosaic_0001>
module attributes {stable_mosaic.version = 11 : i64} {
  func.func @_tp2_kernel(%arg0: i32, %arg1: memref<2x1024xf32, #tpu.memory_space<vmem>>, %arg2: memref<2x1024xf32, #tpu.memory_space<vmem>>) attributes {dimension_semantics = [#tpu.dimension_semantics<parallel>], iteration_bounds = array<i64: 1>, scalar_prefetch = 0 : i64, scratch_operands = 0 : i64, tpu.core_type = #tpu.core_type<tc>, window_params = [{transform_indices = @transform_0, window_bounds = array<i64: 2, 1024>}, {transform_indices = @transform_1, window_bounds = array<i64: 2, 1024>}]} {
    %c0 = arith.constant 0 : index
    %c0_0 = arith.constant 0 : index
    %0 = vector.load %arg1[%c0, %c0_0] : memref<2x1024xf32, #tpu.memory_space<vmem>>, vector<2x1024xf32>
    %cst = arith.constant 0.861199975 : f32
    %1 = vector.broadcast %cst : f32 to vector<2x1024xf32>
    %2 = arith.mulf %1, %0 : vector<2x1024xf32>
    %3 = arith.mulf %2, %0 : vector<2x1024xf32>
    %c0_1 = arith.constant 0 : index
    %c0_2 = arith.constant 0 : index
    %4 = vector.load %arg2[%c0_1, %c0_2] : memref<2x1024xf32, #tpu.memory_space<vmem>>, vector<2x1024xf32>
    tpu.vector_store %arg2[%c0_1, %c0_2], %3 {strides = array<i32>} : memref<2x1024xf32, #tpu.memory_space<vmem>>, vector<2x1024xf32>,
    return
  }
  func.func @transform_0(%arg0: i32) -> (i32, i32) {
    %c0_i32 = arith.constant 0 : i32
    %c0_i32_0 = arith.constant 0 : i32
    return %arg0, %c0_i32 : i32, i32
  }
  func.func @transform_1(%arg0: i32) -> (i32, i32) {
    %c0_i32 = arith.constant 0 : i32
    %c0_i32_0 = arith.constant 0 : i32
    return %arg0, %c0_i32 : i32, i32
  }
}

</mosaic_0001>

<bundles_post_ra>
// kernel: tpu_custom_call.1
= control target key start
LH: loop header
LB: loop body
LE: loop exit
PB: predicated region body
PF: predicated region fallthrough
CT: control target
= control target key end

     0   :  { %6 = vsyncpa [#allocation3], 0  ;;  %s130_s0 = inlined_call_operand.hbm [shape: f32[2,1024], index: 0, kind: input, shape index: {}]   ;;  %s131_s1 = inlined_call_operand.hbm [shape: f32[2,1024], index: 1, kind: output, shape index: {}]  }
   0x1   :  { %7 = vsyncpa [#allocation4], 0  ;;  %s94_s6 = smov [#allocation2]   ;;  %s46_s10 = scalar_lea.hbm %s130_s0, 256 }
   0x2   :  { %s14_s7 = sshll.u32 %s94_s6, 4  ;;  %p47_p0 = scmp.ne.s32.totalorder %s130_s0, %s46_s10  ;;  %s15_s7 = int_to_ptr.vmem [resolvable:$true] %s14_s7 }
   0x3   :  { %p50_p1 = scmp.lt.u32.totalorder %s46_s10, %s130_s0 }
   0x5   :  { %p52_p2 = pnand %p50_p1, %p47_p0 }
   0x7   :  { %55 = shalt.err (!%p52_p2)
}
   0x8   :  { %s56_s15 = scalar_lea.vmem %s15_s7, 256  ;;  %p61_p4 = scmp.lt.s32.totalorder %s15_s7, %s15_s7 }
   0x9   :  { %p57_p3 = scmp.ne.s32.totalorder %s15_s7, %s56_s15  ;;  %p62_p5 = scmp.lt.s32.totalorder %s56_s15, %s56_s15 }
   0xb   :  { %p63_p6 = por %p62_p5, %p61_p4 }
   0xd   :  { %p64_p7 = pnand %p63_p6, %p57_p3 }
   0xf   :  { %67 = shalt.err (!%p64_p7)
}
  0x10   :  { %17 = dma.hbm_to_vmem [thread:$0]  %s130_s0, 256, %s15_s7, [#allocation3]  }
  0x11   :  { %90 = dma.done.wait [#allocation3], 256  }
  0x12   :  { %91 = vsyncadd [#allocation3], 4294967040  ;;  %v21_v0 = vld [vmem:[#allocation2] sm:$0xff]  ;;  %v22_v1 = vld [vmem:[#allocation2 + $0x8] sm:$0xff]  ;;  %s95_s18 = smov [#allocation5]  }
  0x13   :  { %s35_s19 = sshll.u32 %s95_s18, 4  ;;  %v23_v2 = vmul.f32 0.8612, %v21_v0  ;;  %v24_v3 = vmul.f32 0.8612, %v22_v1  ;;  %s36_s19 = int_to_ptr.vmem [resolvable:$true] %s35_s19 }
  0x14   :  { %s68_s20 = scalar_lea.vmem %s36_s19, 256  ;;  %p73_p9 = scmp.lt.s32.totalorder %s36_s19, %s36_s19 }
  0x15   :  { %v25_v4 = vmul.f32 %v23_v2, %v21_v0  ;;  %v26_v5 = vmul.f32 %v24_v3, %v22_v1  ;;  %p69_p8 = scmp.ne.s32.totalorder %s36_s19, %s68_s20  ;;  %p74_p10 = scmp.lt.s32.totalorder %s68_s20, %s68_s20 }
  0x17   :  { %27 = vst [vmem:[#allocation5] sm:$0xff] %v25_v4  ;;  %28 = vst [vmem:[#allocation5 + $0x8] sm:$0xff] %v26_v5  ;;  %p75_p11 = por %p74_p10, %p73_p9 }
  0x19   :  { %p76_p12 = pnand %p75_p11, %p69_p8 }
  0x1b   :  { %79 = shalt.err (!%p76_p12)
}
  0x1c   :  { %s80_s22 = scalar_lea.hbm %s131_s1, 256 }
  0x1d   :  { %p81_p13 = scmp.ne.s32.totalorder %s131_s1, %s80_s22  ;;  %p84_p0 = scmp.lt.u32.totalorder %s80_s22, %s131_s1 }
  0x1f   :  { %p86_p1 = pnand %p84_p0, %p81_p13 }
  0x21   :  { %89 = shalt.err (!%p86_p1)
}
  0x22   :  { %38 = dma.vmem_to_hbm [thread:$0]  %s36_s19, 256, %s131_s1, [#allocation4]  }
  0x23   :  { %92 = dma.done.wait [#allocation4], 256  }
  0x24   :  { %93 = vsyncadd [#allocation4], 4294967040 }
  0x25   :  { %42 = vsyncpa [#allocation3], 1 }
  0x26   :  { %43 = vsyncpa [#allocation4], 1 }

</bundles_post_ra>
